<compile_context>
chip_gen: v5e
topology: v5e:2x2
jax: 0.10.0
libtpu: 0.0.40
codegen_flags: <defaults>
</compile_context>

<pallas_src>
import functools
import numpy as np
import jax
import jax.numpy as jnp
from jax.experimental import pallas as pl
from jax.experimental.pallas import tpu as pltpu


D_PAD = 128   # lane-dense feature width for all embedding tensors
SUBLANE = 8


def _round_up(x, m):
    return ((x + m - 1) // m) * m


# ----------------------------------------------------------------------------
# Pallas kernel 1: CenterIntersection
#   embeddings: (K, B, D)  (K = number of intersected branches)
#   h   = relu(emb @ W1t + b1)
#   a   = h @ W2t + b2
#   att = softmax over K (axis 0)
#   out = sum_k att[k] * emb[k]            -> (B, D)
# ----------------------------------------------------------------------------
def center_intersection_pallas(emb, w1t_bf16, b1, w2t_bf16, b2):
    K, B, D = emb.shape
    tb = min(_round_up(B, SUBLANE), 128)       # rows per grid step
    B_pad = _round_up(B, tb)
    if B_pad != B:
        emb = jnp.pad(emb, ((0, 0), (0, B_pad - B), (0, 0)))

    def kernel(x_ref, w1_ref, b1_ref, w2_ref, b2_ref, out_ref):
        x32 = x_ref[...].astype(jnp.float32)                 # (K, tb, D)
        xf = x32.reshape(K * tb, D)                          # fuse K branch matmuls
        h = jnp.maximum(
            jnp.dot(xf.astype(jnp.bfloat16), w1_ref[...],
                    preferred_element_type=jnp.float32) + b1_ref[...], 0.0)
        a = jnp.dot(h.astype(jnp.bfloat16), w2_ref[...],
                    preferred_element_type=jnp.float32) + b2_ref[...]
        a = a.reshape(K, tb, D)
        # softmax over the K branch axis (leading dim -> pure VPU work)
        m = jnp.max(a, axis=0, keepdims=True)
        e = jnp.exp(a - m)
        att = e / jnp.sum(e, axis=0, keepdims=True)          # exact softmax
        out_ref[...] = jnp.sum(att * x32, axis=0)

    out = pl.pallas_call(
        kernel,
        out_shape=jax.ShapeDtypeStruct((B_pad, D), jnp.float32),
        grid=(B_pad // tb,),
        in_specs=[
            pl.BlockSpec((K, tb, D), lambda i: (0, i, 0)),
            pl.BlockSpec((D, D), lambda i: (0, 0)),
            pl.BlockSpec((1, D), lambda i: (0, 0)),
            pl.BlockSpec((D, D), lambda i: (0, 0)),
            pl.BlockSpec((1, D), lambda i: (0, 0)),
        ],
        out_specs=pl.BlockSpec((tb, D), lambda i: (i, 0)),
        compiler_params=pltpu.CompilerParams(
            dimension_semantics=("parallel",),
            vmem_limit_bytes=32 * 1024 * 1024),
    )(emb, w1t_bf16, b1, w2t_bf16, b2)
    return out[:B]


# ----------------------------------------------------------------------------
# Pallas kernel 2: fused cal_logit_vec with in-kernel entity gather
#   logit[b, n] = gamma - || entity_table[ent_idx[b, n]] - query[b] ||_1
# ----------------------------------------------------------------------------
def _pick_tn(c):
    """Largest lane-dense N tile that still leaves >= 2 grid steps along N
    (keeps both v7x TensorCores fed) whenever the padded column count allows."""
    for cand in (1024, 512, 256, 128):
        if c % cand == 0 and c // cand >= 2:
            return cand
    return 128


def l1_logit_gather_pallas(ent_idx, query, entity_table, gamma):
    """
    ent_idx:      (Bp, Cp) int32, Bp % 8 == 0, Cp % 128 == 0 (pre-padded)
    query:        (Bp, 1, D) float32
    entity_table: (nentity, D) float32 -- stays in HBM; rows are DMA-gathered
                  in-kernel, so no (B, N, D) gather is materialized in HBM.
    returns:      (Bp, Cp) float32 logits
    """
    Bp, Cp = ent_idx.shape
    _, D = entity_table.shape
    assert Bp % SUBLANE == 0 and Cp % 128 == 0 and D % 128 == 0
    assert query.shape == (Bp, 1, D)

    tb = SUBLANE               # batch rows per tile (Bp is padded to 8)
    tn = _pick_tn(Cp)          # candidate entities per tile
    nrows = tb * tn
    gamma_f = float(gamma)

    def kernel(idx_ref, q_ref, ent_hbm, out_ref, ebuf, sem):
        row0 = pl.program_id(0) * tb
        col0 = pl.program_id(1) * tn

        # Issue every row-gather DMA for this tile (they all overlap), then
        # drain the shared semaphore with size-matched waits.
        @pl.loop(0, nrows)
        def _gather(r):
            b = r // tn
            n = r - b * tn
            eid = idx_ref[row0 + b, col0 + n]
            pltpu.make_async_copy(ent_hbm.at[eid], ebuf.at[b, n],
                                  sem.at[0]).start()

        @pl.loop(0, nrows)
        def _drain(r):
            b = r // tn
            n = r - b * tn
            # source index is irrelevant for wait (only sizes the sem wait)
            pltpu.make_async_copy(ent_hbm.at[0], ebuf.at[b, n],
                                  sem.at[0]).wait()

        q = q_ref[...].astype(jnp.float32)                     # (tb, 1, D)
        out_ref[...] = gamma_f - jnp.sum(jnp.abs(ebuf[...] - q), axis=-1)

    grid = (Bp // tb, Cp // tn)     # N innermost -> query block stays resident
    return pl.pallas_call(
        kernel,
        out_shape=jax.ShapeDtypeStruct((Bp, Cp), jnp.float32),
        grid_spec=pltpu.PrefetchScalarGridSpec(
            num_scalar_prefetch=1,
            grid=grid,
            in_specs=[
                pl.BlockSpec((tb, 1, D), lambda i, j, idx: (i, 0, 0)),
                pl.BlockSpec(memory_space=pl.ANY),     # entity table in HBM
            ],
            out_specs=pl.BlockSpec((tb, tn), lambda i, j, idx: (i, j)),
            scratch_shapes=[
                pltpu.VMEM((tb, tn, D), jnp.float32),  # gathered rows
                pltpu.SemaphoreType.DMA((1,)),
            ]),
        compiler_params=pltpu.CompilerParams(
            dimension_semantics=("parallel", "parallel"),
            vmem_limit_bytes=32 * 1024 * 1024),
    )(ent_idx, query, entity_table)


# ----------------------------------------------------------------------------
# Plain-JAX glue reproducing GQE.forward_vec semantics
# ----------------------------------------------------------------------------
def embed_query(params, queries, query_structure, idx, center_fn):
    all_relation_flag = True
    for ele in query_structure[-1]:
        if ele not in ['r', 'n']:
            all_relation_flag = False
            break
    if all_relation_flag:
        if query_structure[0] == 'e':
            embedding = params['entity'][queries[:, idx]]
            idx += 1
        else:
            embedding, idx = embed_query(params, queries, query_structure[0],
                                         idx, center_fn)
        for i in range(len(query_structure[-1])):
            assert query_structure[-1][i] != 'n', \
                'vec cannot handle queries with negation'
            embedding = embedding + params['relation'][queries[:, idx]]
            idx += 1
    else:
        emb_list = []
        for i in range(len(query_structure)):
            embedding, idx = embed_query(params, queries, query_structure[i],
                                         idx, center_fn)
            emb_list.append(embedding)
        embedding = center_fn(jnp.stack(emb_list))
    return embedding, idx


def transform_union_query(queries, query_structure, query_name_dict):
    if query_name_dict[query_structure] == '2u-DNF':
        queries = queries[:, :-1]
    elif query_name_dict[query_structure] == 'up-DNF':
        queries = jnp.concatenate(
            [jnp.concatenate([queries[:, :2], queries[:, 5:6]], axis=1),
             jnp.concatenate([queries[:, 2:4], queries[:, 5:6]], axis=1)],
            axis=1)
    queries = queries.reshape(queries.shape[0] * 2, -1)
    return queries


def transform_union_structure(query_structure, query_name_dict):
    if query_name_dict[query_structure] == '2u-DNF':
        return ('e', ('r',))
    elif query_name_dict[query_structure] == 'up-DNF':
        return ('e', ('r', 'r'))


def forward_vec(params, positive_sample, negative_sample, subsampling_weight,
                batch_queries_dict, batch_idxs_dict, query_name_dict,
                center_fn, fused_logit_fn):
    D = params['entity'].shape[1]
    all_center, all_idxs = [], []
    all_union_center, all_union_idxs = [], []

    for qs in batch_queries_dict:
        if 'u' in query_name_dict[qs]:
            ce, _ = embed_query(
                params,
                transform_union_query(batch_queries_dict[qs], qs,
                                      query_name_dict),
                transform_union_structure(qs, query_name_dict), 0, center_fn)
            all_union_center.append(ce)
            all_union_idxs.extend(batch_idxs_dict[qs])
        else:
            ce, _ = embed_query(params, batch_queries_dict[qs], qs, 0,
                                center_fn)
            all_center.append(ce)
            all_idxs.extend(batch_idxs_dict[qs])

    all_center_emb = None
    all_union_center_emb = None
    if len(all_center) > 0:
        all_center_emb = jnp.concatenate(all_center, axis=0)[:, None, :]
    if len(all_union_center) > 0:
        auc = jnp.concatenate(all_union_center, axis=0)[:, None, :]
        all_union_center_emb = auc.reshape(auc.shape[0] // 2, 2, 1, -1)

    ssw = None
    if subsampling_weight is not None:
        ssw = subsampling_weight[jnp.array(all_idxs + all_union_idxs)]

    Br = all_center_emb.shape[0] if all_center_emb is not None else 0
    Bu = all_union_center_emb.shape[0] if all_union_center_emb is not None else 0
    Ball = Br + 2 * Bu

    if (positive_sample is None and negative_sample is None) or Ball == 0:
        return (None, None, ssw, all_idxs + all_union_idxs,
                all_center_emb, all_union_center_emb, None, None)

    # ---- fused query rows: regular rows, then 2x-expanded union/DNF rows ----
    q_rows = []
    if Br > 0:
        q_rows.append(all_center_emb.astype(jnp.float32))
    if Bu > 0:
        q_rows.append(all_union_center_emb.reshape(Bu * 2, 1, D)
                      .astype(jnp.float32))
    q_all = jnp.concatenate(q_rows, axis=0)                 # (Ball, 1, D)

    # ---- fused candidate index matrix: [positive col | negative cols] ------
    # (2x union expansion duplicates int32 indices only, never embedding rows)
    idx_cols = []
    n_pos = 0
    if positive_sample is not None:
        cols = []
        if Br > 0:
            cols.append(positive_sample[jnp.array(all_idxs)][:, None])
        if Bu > 0:
            cols.append(jnp.repeat(
                positive_sample[jnp.array(all_union_idxs)][:, None], 2, axis=0))
        idx_cols.append(jnp.concatenate(cols, axis=0))
        n_pos = 1
    n_neg = 0
    if negative_sample is not None:
        n_neg = negative_sample.shape[1]
        cols = []
        if Br > 0:
            cols.append(negative_sample[jnp.array(all_idxs)])
        if Bu > 0:
            cols.append(jnp.repeat(
                negative_sample[jnp.array(all_union_idxs)], 2, axis=0))
        idx_cols.append(jnp.concatenate(cols, axis=0))
    idx_all = jnp.concatenate(idx_cols, axis=1).astype(jnp.int32)

    # pad rows to a sublane multiple, columns to a lane multiple (dummy id 0)
    n_cols = n_pos + n_neg
    Bp = _round_up(Ball, SUBLANE)
    Cp = _round_up(n_cols, 128)
    idx_pad = jnp.pad(idx_all, ((0, Bp - Ball), (0, Cp - n_cols)))
    q_pad = jnp.pad(q_all, ((0, Bp - Ball), (0, 0), (0, 0)))

    logits = fused_logit_fn(idx_pad, q_pad)[:Ball]          # (Ball, Cp)

    # union DNF: max over the 2 branch rows
    parts = []
    if Br > 0:
        parts.append(logits[:Br])
    if Bu > 0:
        parts.append(jnp.max(logits[Br:].reshape(Bu, 2, Cp), axis=1))
    logits = jnp.concatenate(parts, axis=0)                 # (Br + Bu, Cp)

    positive_logit = logits[:, :1] if positive_sample is not None else None
    negative_logit = (logits[:, n_pos:n_pos + n_neg]
                      if negative_sample is not None else None)

    return (positive_logit, negative_logit, ssw,
            all_idxs + all_union_idxs, all_center_emb, all_union_center_emb,
            None, None)


# ----------------------------------------------------------------------------
# lane padding helpers (zero padding -> numerically neutral)
# ----------------------------------------------------------------------------
def pad_lanes(x, d_pad=D_PAD):
    p = d_pad - x.shape[-1]
    if p <= 0:
        return x
    return jnp.pad(x, [(0, 0)] * (x.ndim - 1) + [(0, p)])


def pad_square(w, d_pad=D_PAD):
    p = d_pad - w.shape[0]
    if p <= 0:
        return w
    return jnp.pad(w, ((0, p), (0, p)))


# ----------------------------------------------------------------------------
# main
# ----------------------------------------------------------------------------
if __name__ == "__main__":
    nentity, nrelation, emb_dim = 64, 16, 32
    gamma, epsilon = 12.0, 2.0
    emb_range = (gamma + epsilon) / emb_dim

    key = jax.random.PRNGKey(0)
    (k_ent, k_rel, k_w1, k_b1, k_w2, k_b2,
     k_pos, k_neg, k_ssw) = jax.random.split(key, 9)

    entity_embedding = jax.random.uniform(
        k_ent, (nentity, emb_dim), jnp.float32, -emb_range, emb_range)
    relation_embedding = jax.random.uniform(
        k_rel, (nrelation, emb_dim), jnp.float32, -emb_range, emb_range)

    # CenterIntersection params (xavier_uniform weights, torch-default bias)
    xav = (6.0 / (emb_dim + emb_dim)) ** 0.5
    w1 = jax.random.uniform(k_w1, (emb_dim, emb_dim), jnp.float32, -xav, xav)
    w2 = jax.random.uniform(k_w2, (emb_dim, emb_dim), jnp.float32, -xav, xav)
    bb = 1.0 / (emb_dim ** 0.5)
    b1 = jax.random.uniform(k_b1, (1, emb_dim), jnp.float32, -bb, bb)
    b2 = jax.random.uniform(k_b2, (1, emb_dim), jnp.float32, -bb, bb)

    # Lane-padded params.  Centre-net weights are stored bf16 (MXU-native);
    # the entity/relation tables stay f32 so single-row gather DMAs are
    # sublane-aligned 512 B transfers (see TODO about u32-packed bf16 rows).
    params_pallas = dict(
        entity=pad_lanes(entity_embedding),
        relation=pad_lanes(relation_embedding),
        w1t=pad_square(w1.T).astype(jnp.bfloat16),
        b1=pad_lanes(b1),
        w2t=pad_square(w2.T).astype(jnp.bfloat16),
        b2=pad_lanes(b2),
    )

    # query structures: 1p, 2i (intersection -> center_net), 2u-DNF (union)
    Q1P = ('e', ('r',))
    Q2I = (('e', ('r',)), ('e', ('r',)))
    Q2U = (('e', ('r',)), ('e', ('r',)), ('u',))
    query_name_dict = {Q1P: '1p', Q2I: '2i', Q2U: '2u-DNF'}
    # TODO(synk): 'up-DNF' transform implemented but not exercised in this demo.

    queries_1p = jnp.array([[3, 1], [10, 5]], dtype=jnp.int32)
    queries_2i = jnp.array([[7, 2, 20, 9], [31, 0, 5, 4]], dtype=jnp.int32)
    queries_2u = jnp.array([[12, 3, 45, 7, -1]], dtype=jnp.int32)
    batch_queries_dict = {Q1P: queries_1p, Q2I: queries_2i, Q2U: queries_2u}
    batch_idxs_dict = {Q1P: [0, 1], Q2I: [2, 3], Q2U: [4]}

    total_batch, neg_size = 5, 16
    positive_sample = jax.random.randint(k_pos, (total_batch,), 0, nentity)
    negative_sample = jax.random.randint(k_neg, (total_batch, neg_size),
                                         0, nentity)
    subsampling_weight = jax.random.uniform(k_ssw, (total_batch,), jnp.float32)

    # Pallas-backed compute
    center_fn = lambda stacked: center_intersection_pallas(
        stacked, params_pallas['w1t'], params_pallas['b1'],
        params_pallas['w2t'], params_pallas['b2'])
    fused_logit_fn = functools.partial(
        l1_logit_gather_pallas,
        entity_table=params_pallas['entity'], gamma=gamma)

    out = forward_vec(params_pallas, positive_sample, negative_sample,
                      subsampling_weight, batch_queries_dict, batch_idxs_dict,
                      query_name_dict, center_fn, fused_logit_fn)
    positive_logit, negative_logit = out[0], out[1]
    jax.block_until_ready((positive_logit, negative_logit, out[2]))

    # ---------------- pure-JAX reference (original torch structure) ----------
    def center_ref(stacked):
        # mirrors the kernel: bf16-rounded matmul operands, f32 accumulation
        xb = stacked.astype(jnp.bfloat16).astype(jnp.float32)
        w1f = params_pallas['w1t'].astype(jnp.float32)
        w2f = params_pallas['w2t'].astype(jnp.float32)
        h = jax.nn.relu(xb @ w1f + params_pallas['b1'])
        a = h.astype(jnp.bfloat16).astype(jnp.float32) @ w2f + params_pallas['b2']
        att = jax.nn.softmax(a, axis=0)
        return jnp.sum(att * stacked, axis=0)

    def ref_forward():
        p = params_pallas
        ent = p['entity']
        r_center, r_idxs, u_center, u_idxs = [], [], [], []
        for qs in batch_queries_dict:
            if 'u' in query_name_dict[qs]:
                ce, _ = embed_query(
                    p, transform_union_query(batch_queries_dict[qs], qs,
                                             query_name_dict),
                    transform_union_structure(qs, query_name_dict), 0,
                    center_ref)
                u_center.append(ce)
                u_idxs.extend(batch_idxs_dict[qs])
            else:
                ce, _ = embed_query(p, batch_queries_dict[qs], qs, 0,
                                    center_ref)
                r_center.append(ce)
                r_idxs.extend(batch_idxs_dict[qs])
        ce = jnp.concatenate(r_center, 0)[:, None, :]
        uce = jnp.concatenate(u_center, 0)[:, None, :].reshape(
            len(u_idxs), 2, 1, -1)

        def lg(e, q):
            return gamma - jnp.sum(jnp.abs(e - q), axis=-1)

        pe = ent[positive_sample[jnp.array(r_idxs)]][:, None, :]
        pos = jnp.concatenate(
            [lg(pe, ce),
             jnp.max(lg(ent[positive_sample[jnp.array(u_idxs)]]
                        [:, None, None, :], uce), axis=1)], 0)
        nr = negative_sample[jnp.array(r_idxs)]
        nu = negative_sample[jnp.array(u_idxs)]
        neg = jnp.concatenate(
            [lg(ent[nr.reshape(-1)].reshape(nr.shape[0], nr.shape[1], -1), ce),
             jnp.max(lg(ent[nu.reshape(-1)].reshape(nu.shape[0], 1,
                                                    nu.shape[1], -1), uce),
                     axis=1)], 0)
        ssw_ref = subsampling_weight[jnp.array(r_idxs + u_idxs)]
        return pos, neg, ssw_ref

    ref_pos, ref_neg, ref_ssw = ref_forward()

    assert positive_logit.shape == (total_batch, 1)
    assert negative_logit.shape == (total_batch, neg_size)
    np.testing.assert_allclose(np.asarray(positive_logit), np.asarray(ref_pos),
                               rtol=2e-3, atol=2e-3)
    np.testing.assert_allclose(np.asarray(negative_logit), np.asarray(ref_neg),
                               rtol=2e-3, atol=2e-3)
    np.testing.assert_allclose(np.asarray(out[2]), np.asarray(ref_ssw),
                               rtol=1e-6, atol=1e-6)

    print("KERNEL_OK")
</pallas_src>

<mosaic_0001>
module attributes {stable_mosaic.version = 11 : i64} {
  func.func @kernel(%arg0: i32, %arg1: memref<2x8x128xf32, #tpu.memory_space<vmem>>, %arg2: memref<128x128xbf16, #tpu.memory_space<vmem>>, %arg3: memref<1x128xf32, #tpu.memory_space<vmem>>, %arg4: memref<128x128xbf16, #tpu.memory_space<vmem>>, %arg5: memref<1x128xf32, #tpu.memory_space<vmem>>, %arg6: memref<8x128xf32, #tpu.memory_space<vmem>>) attributes {dimension_semantics = [#tpu.dimension_semantics<parallel>], iteration_bounds = array<i64: 1>, scalar_prefetch = 0 : i64, scratch_operands = 0 : i64, tpu.core_type = #tpu.core_type<tc>, window_params = [{transform_indices = @transform_0, window_bounds = array<i64: 2, 8, 128>}, {pipeline_mode = #tpu.pipeline_mode<synchronous>, transform_indices = @transform_1, window_bounds = array<i64: 128, 128>}, {pipeline_mode = #tpu.pipeline_mode<synchronous>, transform_indices = @transform_2, window_bounds = array<i64: 1, 128>}, {pipeline_mode = #tpu.pipeline_mode<synchronous>, transform_indices = @transform_3, window_bounds = array<i64: 128, 128>}, {pipeline_mode = #tpu.pipeline_mode<synchronous>, transform_indices = @transform_4, window_bounds = array<i64: 1, 128>}, {transform_indices = @transform_5, window_bounds = array<i64: 8, 128>}]} {
    %c0 = arith.constant 0 : index
    %c0_0 = arith.constant 0 : index
    %c0_1 = arith.constant 0 : index
    %0 = vector.load %arg1[%c0, %c0_0, %c0_1] : memref<2x8x128xf32, #tpu.memory_space<vmem>>, vector<2x8x128xf32>
    %1 = vector.shape_cast %0 : vector<2x8x128xf32> to vector<16x128xf32>
    %2 = arith.truncf %1 : vector<16x128xf32> to vector<16x128xbf16>
    %c0_2 = arith.constant 0 : index
    %c0_3 = arith.constant 0 : index
    %3 = vector.load %arg2[%c0_2, %c0_3] : memref<128x128xbf16, #tpu.memory_space<vmem>>, vector<128x128xbf16>
    %cst = arith.constant dense<0.000000e+00> : vector<16x128xf32>
    %4 = tpu.matmul %2, %3, %cst {dimension_numbers = #tpu.dot_dimension_numbers<[1], [0], [0], [1], [0, 0, 1, 1], [], []>} : vector<16x128xbf16>, vector<128x128xbf16>, vector<16x128xf32> -> vector<16x128xf32>
    %c0_4 = arith.constant 0 : index
    %c0_5 = arith.constant 0 : index
    %5 = vector.load %arg3[%c0_4, %c0_5] : memref<1x128xf32, #tpu.memory_space<vmem>>, vector<1x128xf32>
    %6 = vector.broadcast %5 : vector<1x128xf32> to vector<16x128xf32>
    %7 = arith.addf %4, %6 : vector<16x128xf32>
    %cst_6 = arith.constant 0.000000e+00 : f32
    %8 = vector.broadcast %cst_6 : f32 to vector<16x128xf32>
    %9 = arith.maximumf %7, %8 : vector<16x128xf32>
    %10 = arith.truncf %9 : vector<16x128xf32> to vector<16x128xbf16>
    %c0_7 = arith.constant 0 : index
    %c0_8 = arith.constant 0 : index
    %11 = vector.load %arg4[%c0_7, %c0_8] : memref<128x128xbf16, #tpu.memory_space<vmem>>, vector<128x128xbf16>
    %cst_9 = arith.constant dense<0.000000e+00> : vector<16x128xf32>
    %12 = tpu.matmul %10, %11, %cst_9 {dimension_numbers = #tpu.dot_dimension_numbers<[1], [0], [0], [1], [0, 0, 1, 1], [], []>} : vector<16x128xbf16>, vector<128x128xbf16>, vector<16x128xf32> -> vector<16x128xf32>
    %c0_10 = arith.constant 0 : index
    %c0_11 = arith.constant 0 : index
    %13 = vector.load %arg5[%c0_10, %c0_11] : memref<1x128xf32, #tpu.memory_space<vmem>>, vector<1x128xf32>
    %14 = vector.broadcast %13 : vector<1x128xf32> to vector<16x128xf32>
    %15 = arith.addf %12, %14 : vector<16x128xf32>
    %16 = vector.shape_cast %15 : vector<16x128xf32> to vector<2x8x128xf32>
    %cst_12 = arith.constant dense<0xFF800000> : vector<8x128xf32>
    %17 = vector.multi_reduction <maximumf>, %16, %cst_12 [0] : vector<2x8x128xf32> to vector<8x128xf32>
    %18 = vector.shape_cast %17 : vector<8x128xf32> to vector<1x8x128xf32>
    %19 = vector.broadcast %18 : vector<1x8x128xf32> to vector<2x8x128xf32>
    %20 = arith.subf %16, %19 : vector<2x8x128xf32>
    %21 = math.exp %20 : vector<2x8x128xf32>
    %cst_13 = arith.constant dense<0.000000e+00> : vector<8x128xf32>
    %22 = vector.multi_reduction <add>, %21, %cst_13 [0] : vector<2x8x128xf32> to vector<8x128xf32>
    %23 = vector.shape_cast %22 : vector<8x128xf32> to vector<1x8x128xf32>
    %24 = vector.broadcast %23 : vector<1x8x128xf32> to vector<2x8x128xf32>
    %25 = arith.divf %21, %24 : vector<2x8x128xf32>
    %26 = arith.mulf %25, %0 : vector<2x8x128xf32>
    %cst_14 = arith.constant dense<0.000000e+00> : vector<8x128xf32>
    %27 = vector.multi_reduction <add>, %26, %cst_14 [0] : vector<2x8x128xf32> to vector<8x128xf32>
    %c0_15 = arith.constant 0 : index
    %c0_16 = arith.constant 0 : index
    %28 = vector.load %arg6[%c0_15, %c0_16] : memref<8x128xf32, #tpu.memory_space<vmem>>, vector<8x128xf32>
    tpu.vector_store %arg6[%c0_15, %c0_16], %27 {strides = array<i32>} : memref<8x128xf32, #tpu.memory_space<vmem>>, vector<8x128xf32>,
    return
  }
  func.func @transform_0(%arg0: i32) -> (i32, i32, i32) {
    %c0_i32 = arith.constant 0 : i32
    %c0_i32_0 = arith.constant 0 : i32
    %c0_i32_1 = arith.constant 0 : i32
    return %c0_i32, %arg0, %c0_i32_0 : i32, i32, i32
  }
  func.func @transform_1(%arg0: i32) -> (i32, i32) {
    %c0_i32 = arith.constant 0 : i32
    %c0_i32_0 = arith.constant 0 : i32
    %c0_i32_1 = arith.constant 0 : i32
    return %c0_i32, %c0_i32_0 : i32, i32
  }
  func.func @transform_2(%arg0: i32) -> (i32, i32) {
    %c0_i32 = arith.constant 0 : i32
    %c0_i32_0 = arith.constant 0 : i32
    %c0_i32_1 = arith.constant 0 : i32
    return %c0_i32, %c0_i32_0 : i32, i32
  }
  func.func @transform_3(%arg0: i32) -> (i32, i32) {
    %c0_i32 = arith.constant 0 : i32
    %c0_i32_0 = arith.constant 0 : i32
    %c0_i32_1 = arith.constant 0 : i32
    return %c0_i32, %c0_i32_0 : i32, i32
  }
  func.func @transform_4(%arg0: i32) -> (i32, i32) {
    %c0_i32 = arith.constant 0 : i32
    %c0_i32_0 = arith.constant 0 : i32
    %c0_i32_1 = arith.constant 0 : i32
    return %c0_i32, %c0_i32_0 : i32, i32
  }
  func.func @transform_5(%arg0: i32) -> (i32, i32) {
    %c0_i32 = arith.constant 0 : i32
    %c0_i32_0 = arith.constant 0 : i32
    return %arg0, %c0_i32 : i32, i32
  }
}

</mosaic_0001>

<bundles_post_ra>
// kernel: tpu_custom_call.1
= control target key start
LH: loop header
LB: loop body
LE: loop exit
PB: predicated region body
PF: predicated region fallthrough
CT: control target
= control target key end

     0   :  { %10 = vsyncpa [#allocation3], 0  ;;  %s538_s0 = inlined_call_operand.hbm [shape: f32[2,8,128], index: 0, kind: input, shape index: {}]   ;;  %s539_s1 = inlined_call_operand.hbm [shape: bf16[128,128], index: 1, kind: input, shape index: {}]   ;;  %s540_s2 = inlined_call_operand.vmem [shape: f32[1,128], index: 2, kind: input, shape index: {}]   ;;  %s541_s3 = inlined_call_operand.hbm [shape: bf16[128,128], index: 3, kind: input, shape index: {}]   ;;  %s542_s4 = inlined_call_operand.vmem [shape: f32[1,128], index: 4, kind: input, shape index: {}]   ;;  %s543_s5 = inlined_call_operand.hbm [shape: f32[8,128], index: 5, kind: output, shape index: {}]  }
   0x1   :  { %11 = vsyncpa [#allocation6], 0  ;;  %s30_s20 = sshll.u32 %s539_s1, 4  ;;  %s31_s20 = int_to_ptr.hbm [resolvable:$true] %s30_s20 }
   0x2   :  { %12 = vsyncpa [#allocation4], 0  ;;  %s482_s21 = smov [#allocation5]   ;;  %s17_s25 = sshll.u32 %s538_s0, 4  ;;  %s18_s25 = int_to_ptr.hbm [resolvable:$true] %s17_s25 }
   0x3   :  { %s32_s22 = sshll.u32 %s482_s21, 4  ;;  %s483_s26 = smov 64   ;;  %s33_s22 = int_to_ptr.vmem [resolvable:$true] %s32_s22 }
   0x4   :  { %s484_s27 = smov 4   ;;  %s485_s28 = smov [#allocation2]  }
   0x5   :  { %38 = dma.hbm_to_vmem [thread:$0]  %s31_s20, 1024, %s33_s22, [#allocation6], %s483_s26, %s483_s26, %s484_s27  }
   0x6   :  { %s19_s29 = sshll.u32 %s485_s28, 4  ;;  %s486_s30 = smov 128   ;;  %s20_s29 = int_to_ptr.vmem [resolvable:$true] %s19_s29 }
   0x7   :  { %s487_s6 = smov 8   ;;  %s45_s8 = sshll.u32 %s541_s3, 4  ;;  %s46_s8 = int_to_ptr.hbm [resolvable:$true] %s45_s8 }
   0x8   :  { %25 = dma.hbm_to_vmem [thread:$0]  %s18_s25, 256, %s20_s29, [#allocation3], %s486_s30, %s486_s30, %s487_s6  }
   0x9   :  { %s488_s9 = smov [#allocation7]  }
   0xa   :  { %s47_s10 = sshll.u32 %s488_s9, 4  ;;  %s48_s10 = int_to_ptr.vmem [resolvable:$true] %s47_s10 }
   0xb   :  { %53 = dma.hbm_to_vmem [thread:$0]  %s46_s8, 1024, %s48_s10, [#allocation6], %s483_s26, %s483_s26, %s484_s27  }
   0xc   :  { %476 = dma.done.wait [#allocation3], 256  }
   0xd   :  { %477 = vsyncadd [#allocation3], 4294967040 }
   0xe   :  { %478 = dma.done.wait [#allocation6], 2048  }
   0xf   :  { %479 = vsyncadd [#allocation6], 4294965248  ;;  %v355_v0 = vld [vmem:[#allocation5 + $0x38] sm:$0xff]  ;;  %v354_v1 = vld [vmem:[#allocation5 + $0x30] sm:$0xff]  ;;  %s273_s15 = sshll.u32 %s543_s5, 4  ;;  %s274_s15 = int_to_ptr.hbm [resolvable:$true] %s273_s15 }
  0x10   :  { %139 = vmatpush.bf16.msra.mxu0 %v355_v0  ;;  %v363_v2 = vld [vmem:[#allocation7 + $0x38] sm:$0xff]  ;;  %v362_v3 = vld [vmem:[#allocation7 + $0x30] sm:$0xff]  ;;  %v353_v4 = vld [vmem:[#allocation5 + $0x28] sm:$0xff] }
  0x11   :  { %224 = vmatpush.bf16.msra.mxu1 %v363_v2  ;;  %v361_v5 = vld [vmem:[#allocation7 + $0x28] sm:$0xff]  ;;  %v352_v6 = vld [vmem:[#allocation5 + $0x20] sm:$0xff]  ;;  %v351_v8 = vld [vmem:[#allocation5 + $0x18] sm:$0xff] }
  0x12   :  { %v360_v7 = vld [vmem:[#allocation7 + $0x20] sm:$0xff]  ;;  %v350_v9 = vld [vmem:[#allocation5 + $0x10] sm:$0xff]  ;;  %v349_v10 = vld [vmem:[#allocation5 + $0x8] sm:$0xff] }
  0x13   :  { %v348_v11 = vld [vmem:[#allocation5] sm:$0xff]  ;;  %v68_v12 = vld [vmem:[#allocation2] sm:$0xff]  ;;  %v69_v13 = vld [vmem:[#allocation2 + $0x8] sm:$0xff] }
  0x14   :  { %140 = vmatpush.bf16.msra.mxu0 %v354_v1  ;;  %v70_v14 = vpack.c.bf16 %v69_v13, %v68_v12  ;;  %v359_v15 = vld [vmem:[#allocation7 + $0x18] sm:$0xff]  ;;  %v358_v16 = vld [vmem:[#allocation7 + $0x10] sm:$0xff]  ;;  %v357_v17 = vld [vmem:[#allocation7 + $0x8] sm:$0xff] }
  0x15   :  { %225 = vmatpush.bf16.msra.mxu1 %v362_v3  ;;  %v356_v18 = vld [vmem:[#allocation7] sm:$0xff]  ;;  %v372_v20 = vld [vmem:[%s540_s2] ss:$0 sm:$0xff]  ;;  %s489_s2 = smov [#allocation8]  }
  0x16   :  { %v373_v28 = vld [vmem:[%s542_s4] ss:$0 sm:$0xff]  ;;  %s271_s4 = sshll.u32 %s489_s2, 4  ;;  %s272_s4 = int_to_ptr.vmem [resolvable:$true] %s271_s4 }
  0x18   :  { %141 = vmatpush.bf16.msra.mxu0 %v353_v4 }
  0x19   :  { %226 = vmatpush.bf16.msra.mxu1 %v361_v5 }
  0x1c   :  { %142 = vmatpush.bf16.msra.mxu0 %v352_v6 }
  0x1d   :  { %227 = vmatpush.bf16.msra.mxu1 %v360_v7 }
  0x20   :  { %143 = vmatpush.bf16.msra.mxu0 %v351_v8 }
  0x21   :  { %228 = vmatpush.bf16.msra.mxu1 %v359_v15 }
  0x24   :  { %144 = vmatpush.bf16.msra.mxu0 %v350_v9 }
  0x25   :  { %229 = vmatpush.bf16.msra.mxu1 %v358_v16 }
  0x28   :  { %145 = vmatpush.bf16.msra.mxu0 %v349_v10 }
  0x29   :  { %230 = vmatpush.bf16.msra.mxu1 %v357_v17 }
  0x2c   :  { %146 = vmatpush.bf16.msra.mxu0 %v348_v11 }
  0x2d   :  { %231 = vmatpush.bf16.msra.mxu1 %v356_v18 }
  0x2f   :  { %147 = vmatmul.bf16.vlgmr.msra.gmra.mxu0 %v70_v14 }
  0xac   :  { %v148_v19 = vpop.f32.mrf.mxu0 }
  0xad   :  { %v149_v21 = vadd.f32 %v372_v20, %v148_v19 }
  0xaf   :  { %v153_v24 = vmax.f32 %v149_v21, 0.0 }
  0xb4   :  { %v150_v22 = vpop.f32.mrf.mxu0 }
  0xb5   :  { %v151_v23 = vadd.f32 %v372_v20, %v150_v22 }
  0xb7   :  { %v154_v25 = vmax.f32 %v151_v23, 0.0 }
  0xb9   :  { %v155_v26 = vpack.c.bf16 %v154_v25, %v153_v24 }
  0xbb   :  { %232 = vmatmul.bf16.vlgmr.msra.gmra.mxu1 %v155_v26 }
 0x138   :  { %v233_v27 = vpop.f32.mrf.mxu1 }
 0x139   :  { %v234_v30 = vadd.f32 %v373_v28, %v233_v27 }
 0x140   :  { %v235_v29 = vpop.f32.mrf.mxu1 }
 0x141   :  { %v236_v31 = vadd.f32 %v373_v28, %v235_v29 }
 0x143   :  { %v238_v32 = vmax.f32 %v234_v30, %v236_v31 }
 0x145   :  { %v239_v33 = vsub.f32 %v234_v30, %v238_v32  ;;  %v240_v34 = vsub.f32 %v236_v31, %v238_v32 }
 0x147   :  { %v241_v35 = vmul.f32 1.442695, %v239_v33  ;;  %v243_v36 = vmul.f32 1.442695, %v240_v34 }
 0x149   :  { %374 = vpow2.f32 %v241_v35 }
 0x14a   :  { %376 = vpow2.f32 %v243_v36 }
 0x14f   :  { %v375_v37 = vpop.eup %374 }
 0x150   :  { %v377_v38 = vpop.eup %376 }
 0x151   :  { %v245_v39 = vadd.f32 %v377_v38, %v375_v37 }
 0x153   :  { %378 = vrcp.f32 %v245_v39  ;;  %v257_v43 = vand.u32 2147483648, %v245_v39  ;;  %v255_v45 = vand.u32 2147483647, %v245_v39  ;;  %vm251_vm1 = vweird.f32 %v245_v39 }
 0x155   :  { %v258_v47 = vor.u32 1.1754944e-38, %v257_v43  ;;  %vm256_vm3 = vcmp.eq.f32.partialorder %v255_v45, 8.507059e+37 }
 0x159   :  { %v379_v40 = vpop.eup %378 }
 0x15a   :  { %v247_v41 = vmul.f32 %v379_v40, %v245_v39  ;;  %vm252_vm0 = vweird.f32 %v379_v40 }
 0x15b   :  { %vm253_vm2 = vmor %vm251_vm1, %vm252_vm0 }
 0x15c   :  { %v248_v42 = vsub.f32 1.0, %v247_v41 }
 0x15e   :  { %v249_v44 = vmul.f32 %v379_v40, %v248_v42 }
 0x160   :  { %v250_v46 = vadd.f32 %v379_v40, %v249_v44 }
 0x162   :  { %v254_v48 = vsel %vm253_vm2, %v379_v40, %v250_v46 }
 0x163   :  { %v259_v49 = vsel %vm256_vm3, %v258_v47, %v254_v48 }
 0x164   :  { %v260_v50 = vmul.f32 %v375_v37, %v259_v49  ;;  %v261_v51 = vmul.f32 %v377_v38, %v259_v49 }
 0x166   :  { %v262_v52 = vmul.f32 %v260_v50, %v68_v12  ;;  %v263_v53 = vmul.f32 %v261_v51, %v69_v13 }
 0x168   :  { %v264_v54 = vadd.f32 %v263_v53, %v262_v52 }
 0x16a   :  { %265 = vst [vmem:[#allocation8] sm:$0xff] %v264_v54 }
 0x16b   :  { %276 = dma.vmem_to_hbm [thread:$0]  %s272_s4, 128, %s274_s15, [#allocation4]  }
 0x16c   :  { %480 = dma.done.wait [#allocation4], 128  }
 0x16d   :  { %481 = vsyncadd [#allocation4], 4294967168 }
 0x16e   :  { %281 = vsyncpa [#allocation3], 1 }
 0x16f   :  { %282 = vsyncpa [#allocation6], 1 }
 0x170   :  { %283 = vsyncpa [#allocation4], 1 }

</bundles_post_ra>
